<compile_context>
chip_gen: v7x
topology: tpu7x:2x2x1
jax: 0.10.0
libtpu: 0.0.40
codegen_flags: <defaults>
</compile_context>

<pallas_src>
import jax
import jax.numpy as jnp
from jax.experimental import pallas as pl
from jax.experimental.pallas import tpu as pltpu


def _round_up(x, m):
    return ((x + m - 1) // m) * m


def _make_gru_kernel(n_feats, h_dims):
    """Fused GRUCell body: one MXU dot over the stacked [x | h] slab."""

    def kernel(*refs):
        feat_refs = refs[:n_feats]          # (TB, d_i) unconcatenated pieces
        h_ref = refs[n_feats]               # (TB, H)
        w_ref = refs[n_feats + 1]           # (In+H, 4H) stacked weights (VMEM-resident)
        b_ref = refs[n_feats + 2]           # (1, 4H)   fused bias, f32 (VMEM-resident)
        o_ref = refs[n_feats + 3]           # (TB, H)

        H = h_dims

        # Load h once; the (possibly bf16) load feeds both the matmul slab and
        # (via one cast) the f32 blend — no second read.
        h_mm = h_ref[...]

        # In-kernel concat folds the PyTorch T.cat into the activation slab:
        # one MXU push with K = In+H instead of three K=32/32/32 dots.
        slab = jnp.concatenate([f[...] for f in feat_refs] + [h_mm], axis=-1)

        # One lane-dense (TB, 4H) gate slab, columns [r_sum | z_sum | n_x | n_h]
        # (4H = 128 lanes at H = 32). Accumulate in f32 on the MXU.
        g = jnp.dot(slab, w_ref[...], preferred_element_type=jnp.float32)
        g = g + b_ref[...]

        r = jax.nn.sigmoid(g[:, 0:H])
        z = jax.nn.sigmoid(g[:, H:2 * H])
        n = jnp.tanh(g[:, 2 * H:3 * H] + r * g[:, 3 * H:4 * H])

        h_f32 = h_mm.astype(jnp.float32)
        o_ref[...] = ((1.0 - z) * n + z * h_f32).astype(o_ref.dtype)

    return kernel


def gru_cell_fused(feats, h, w_cat, b_cat, *, batch_tile=2048, min_grid_steps=8,
                   out_dtype=None):
    """Fused GRUCell forward; `feats` are the unconcatenated src['a'] pieces.

    * Activations are cast to the matmul dtype (bf16 by default) BEFORE the
      pallas_call so the DMA moves half the bytes (under jit this cast fuses
      into the producer).
    * Batch is padded to a sublane multiple and always tiled; the tile is as
      large as `batch_tile` but clamped so big batches keep >= min_grid_steps
      steps (v7x: two TensorCores split the "parallel" batch axis).
    * Weights/bias stay VMEM-resident via constant index_maps. With the
      default tile, total VMEM (double-buffered) is a few MB — far below the
      32 MiB scoped default on every generation.
    """
    B, H = h.shape
    n_feats = len(feats)
    feat_widths = [int(f.shape[-1]) for f in feats]
    in_plus_h = sum(feat_widths) + H
    assert w_cat.shape == (in_plus_h, 4 * H)

    act_dtype = jnp.dtype(w_cat.dtype)
    out_dtype = h.dtype if out_dtype is None else out_dtype
    sub = 8 * (4 // act_dtype.itemsize)          # f32 -> 8 rows, bf16 -> 16 rows

    # Cast upstream of the DMA (halves HBM read traffic on the bf16 path).
    feats = [f.astype(act_dtype) for f in feats]
    h_mm = h.astype(act_dtype)

    # Pad batch to a sublane multiple so we always tile (no whole-array block).
    B_pad = _round_up(max(B, sub), sub)
    if B_pad != B:
        pad = B_pad - B
        feats = [jnp.pad(f, ((0, pad), (0, 0))) for f in feats]
        h_mm = jnp.pad(h_mm, ((0, pad), (0, 0)))

    # Tile selection: big tiles amortize per-step overhead; clamp so large B
    # still yields >= min_grid_steps steps (megacore split + pipelining).
    tb_cap = max(sub, _round_up(pl.cdiv(B_pad, min_grid_steps), sub))
    tb = max(sub, min(_round_up(batch_tile, sub), tb_cap, B_pad))
    grid = (pl.cdiv(B_pad, tb),)

    def row_spec(d):
        return pl.BlockSpec((tb, d), lambda b: (b, 0))

    def resident_spec(shape):
        return pl.BlockSpec(shape, lambda b: (0, 0))

    in_specs = (
        [row_spec(d) for d in feat_widths]          # src['a'] pieces
        + [row_spec(H)]                             # h
        + [resident_spec((in_plus_h, 4 * H)),       # stacked weights
           resident_spec((1, 4 * H))]               # fused bias
    )

    cost = pl.CostEstimate(
        flops=2 * B_pad * in_plus_h * 4 * H,
        transcendentals=3 * B_pad * H,
        bytes_accessed=(B_pad * in_plus_h * act_dtype.itemsize        # activations
                        + in_plus_h * 4 * H * act_dtype.itemsize      # weights
                        + 4 * H * 4                                   # bias
                        + B_pad * H * jnp.dtype(out_dtype).itemsize), # output
    )

    out = pl.pallas_call(
        _make_gru_kernel(n_feats, H),
        out_shape=jax.ShapeDtypeStruct((B_pad, H), out_dtype),
        grid=grid,
        in_specs=in_specs,
        out_specs=row_spec(H),
        compiler_params=pltpu.CompilerParams(
            dimension_semantics=("parallel",)),     # v7x: split batch across TCs
        cost_estimate=cost,
    )(*feats, h_mm, w_cat, b_cat)

    return out[:B] if B_pad != B else out


def orthogonal_init(key, shape):
    """Orthogonal init (same spirit as torch.nn.init.orthogonal_)."""
    rows, cols = shape
    n = max(rows, cols)
    a = jax.random.normal(key, (n, n), dtype=jnp.float32)
    q, r = jnp.linalg.qr(a)
    d = jnp.diag(r)
    q = q * jnp.where(d >= 0, 1.0, -1.0)[None, :]
    return q[:rows, :cols]


class MessageModulePallas:
    """JAX/Pallas port of MessageModule (GRUCell(h_dims + g_dims, h_dims))."""

    def __init__(self, h_dims, g_dims, key, matmul_dtype=jnp.bfloat16):
        # bf16 default: v5e's MXU has no native f32 path (f32 decomposes into
        # multiple bf16 passes) and the kernel is HBM-bound on all generations,
        # so bf16 weights + bf16 activation DMA is the fast path everywhere.
        # Gate nonlinearities, bias add, and the final blend stay f32.
        self.h_dims = h_dims
        self.g_dims = g_dims
        self.feat_widths = (h_dims, g_dims)     # src['a'] pieces, kept unconcatenated
        in_dims = h_dims + g_dims
        H = h_dims

        k1, k2, k3, k4 = jax.random.split(key, 4)
        bound = 1.0 / float(h_dims) ** 0.5
        # PyTorch GRUCell default init U(-1/sqrt(H), 1/sqrt(H)); weight_hh is
        # re-initialized orthogonally in the module's __init__.
        self.w_ih = jax.random.uniform(k1, (3 * H, in_dims), minval=-bound,
                                       maxval=bound, dtype=jnp.float32)
        self.w_hh = orthogonal_init(k2, (3 * H, H))
        self.b_ih = jax.random.uniform(k3, (3 * H,), minval=-bound,
                                       maxval=bound, dtype=jnp.float32)
        self.b_hh = jax.random.uniform(k4, (3 * H,), minval=-bound,
                                       maxval=bound, dtype=jnp.float32)

        # ---- One-time fused weight prep (hoisted out of forward) ------------
        # Single stacked (In+H, 4H) weight for one MXU dot over [x | h].
        # Columns: [r_sum | z_sum | n_x | n_h] (lane-dense 128 cols at H=32).
        wih_t = self.w_ih.T                                   # (In, 3H) = [r|z|n]
        whh_t = self.w_hh.T                                   # (H, 3H)  = [r|z|n]
        top = jnp.concatenate(                                # x rows: [r|z|n_x|0]
            [wih_t, jnp.zeros((in_dims, H), jnp.float32)], axis=1)
        bot = jnp.concatenate(                                # h rows: [r|z|0|n_h]
            [whh_t[:, 0:2 * H], jnp.zeros((H, H), jnp.float32),
             whh_t[:, 2 * H:3 * H]], axis=1)
        self.w_cat = jnp.concatenate([top, bot], axis=0).astype(matmul_dtype)

        # Fused bias (kept f32; added once onto the f32 accumulator).
        self.b_cat = jnp.concatenate(
            [self.b_ih[0:2 * H] + self.b_hh[0:2 * H],         # r/z: b_ih + b_hh
             self.b_ih[2 * H:3 * H],                          # n-gate input bias
             self.b_hh[2 * H:3 * H]]                          # n-gate hidden bias
        ).reshape(1, 4 * H).astype(jnp.float32)

    def forward(self, src, dst=None, edge=None):
        # src['a'] pieces are fed to the kernel UNconcatenated; the concat is
        # performed in VMEM inside the kernel (no HBM round-trip for cat()).
        feats = tuple(src['a'])
        assert tuple(int(f.shape[-1]) for f in feats) == self.feat_widths, \
            "src['a'] split must be (h_dims, g_dims)"
        return gru_cell_fused(feats, src['s'], self.w_cat, self.b_cat)


def _gru_reference(x, h, w_ih, w_hh, b_ih, b_hh):
    """Plain-JAX reference (PyTorch GRUCell math) for a sanity check."""
    H = h.shape[-1]
    gi = x @ w_ih.T + b_ih
    gh = h @ w_hh.T + b_hh
    i_r, i_z, i_n = gi[:, :H], gi[:, H:2 * H], gi[:, 2 * H:]
    h_r, h_z, h_n = gh[:, :H], gh[:, H:2 * H], gh[:, 2 * H:]
    r = jax.nn.sigmoid(i_r + h_r)
    z = jax.nn.sigmoid(i_z + h_z)
    n = jnp.tanh(i_n + r * h_n)
    return (1.0 - z) * n + z * h


if __name__ == "__main__":
    h_dims, g_dims, batch = 32, 32, 8

    key = jax.random.PRNGKey(0)
    k_mod, k_a1, k_a2, k_s = jax.random.split(key, 4)

    module = MessageModulePallas(h_dims, g_dims, k_mod)

    # src['a'] is a list of tensors the PyTorch module concatenates along -1.
    src = {
        'a': [
            jax.random.normal(k_a1, (batch, h_dims), dtype=jnp.float32),
            jax.random.normal(k_a2, (batch, g_dims), dtype=jnp.float32),
        ],
        's': jax.random.normal(k_s, (batch, h_dims), dtype=jnp.float32),
    }

    out = jax.block_until_ready(module.forward(src, dst=None, edge=None))

    # Cross-check against the plain-JAX PyTorch-math reference. Tolerance
    # allows for the bf16 weight/activation path (weights, activations, and
    # the h reused in the blend are bf16-rounded; accumulation is f32) vs. the
    # f32 reference — do not tighten below ~3e-2 on the bf16 path.
    x = jnp.concatenate(src['a'], axis=-1)
    ref = _gru_reference(x, src['s'], module.w_ih, module.w_hh,
                         module.b_ih, module.b_hh)
    assert out.shape == (batch, h_dims)
    assert out.dtype == src['s'].dtype
    assert bool(jnp.allclose(out, ref, atol=3e-2, rtol=3e-2))

    print("KERNEL_OK")
</pallas_src>

<mosaic_0001>
module attributes {stable_mosaic.version = 11 : i64} {
  func.func @kernel(%arg0: i32, %arg1: memref<16x32xbf16, #tpu.memory_space<vmem>>, %arg2: memref<16x32xbf16, #tpu.memory_space<vmem>>, %arg3: memref<16x32xbf16, #tpu.memory_space<vmem>>, %arg4: memref<96x128xbf16, #tpu.memory_space<vmem>>, %arg5: memref<1x128xf32, #tpu.memory_space<vmem>>, %arg6: memref<16x32xf32, #tpu.memory_space<vmem>>) attributes {dimension_semantics = [#tpu.dimension_semantics<parallel>], iteration_bounds = array<i64: 1>, scalar_prefetch = 0 : i64, scratch_operands = 0 : i64, tpu.core_type = #tpu.core_type<tc>, window_params = [{transform_indices = @transform_0, window_bounds = array<i64: 16, 32>}, {transform_indices = @transform_1, window_bounds = array<i64: 16, 32>}, {transform_indices = @transform_2, window_bounds = array<i64: 16, 32>}, {pipeline_mode = #tpu.pipeline_mode<synchronous>, transform_indices = @transform_3, window_bounds = array<i64: 96, 128>}, {pipeline_mode = #tpu.pipeline_mode<synchronous>, transform_indices = @transform_4, window_bounds = array<i64: 1, 128>}, {transform_indices = @transform_5, window_bounds = array<i64: 16, 32>}]} {
    %c0 = arith.constant 0 : index
    %c0_0 = arith.constant 0 : index
    %0 = vector.load %arg3[%c0, %c0_0] : memref<16x32xbf16, #tpu.memory_space<vmem>>, vector<16x32xbf16>
    %c0_1 = arith.constant 0 : index
    %c0_2 = arith.constant 0 : index
    %1 = vector.load %arg1[%c0_1, %c0_2] : memref<16x32xbf16, #tpu.memory_space<vmem>>, vector<16x32xbf16>
    %c0_3 = arith.constant 0 : index
    %c0_4 = arith.constant 0 : index
    %2 = vector.load %arg2[%c0_3, %c0_4] : memref<16x32xbf16, #tpu.memory_space<vmem>>, vector<16x32xbf16>
    %3 = tpu.concatenate %1, %2, %0 in 1 : vector<16x32xbf16>, vector<16x32xbf16>, vector<16x32xbf16> -> vector<16x96xbf16>
    %c0_5 = arith.constant 0 : index
    %c0_6 = arith.constant 0 : index
    %4 = vector.load %arg4[%c0_5, %c0_6] : memref<96x128xbf16, #tpu.memory_space<vmem>>, vector<96x128xbf16>
    %cst = arith.constant dense<0.000000e+00> : vector<16x128xf32>
    %5 = tpu.matmul %3, %4, %cst {dimension_numbers = #tpu.dot_dimension_numbers<[1], [0], [0], [1], [0, 0, 1, 1], [], []>} : vector<16x96xbf16>, vector<96x128xbf16>, vector<16x128xf32> -> vector<16x128xf32>
    %c0_7 = arith.constant 0 : index
    %c0_8 = arith.constant 0 : index
    %6 = vector.load %arg5[%c0_7, %c0_8] : memref<1x128xf32, #tpu.memory_space<vmem>>, vector<1x128xf32>
    %7 = vector.broadcast %6 : vector<1x128xf32> to vector<16x128xf32>
    %8 = arith.addf %5, %7 : vector<16x128xf32>
    %9 = vector.extract_strided_slice %8 {offsets = [0, 0], sizes = [16, 32], strides = [1, 1]} : vector<16x128xf32> to vector<16x32xf32>
    %10 = arith.negf %9 : vector<16x32xf32>
    %11 = math.exp %10 : vector<16x32xf32>
    %cst_9 = arith.constant 1.000000e+00 : f32
    %12 = vector.broadcast %cst_9 : f32 to vector<16x32xf32>
    %13 = arith.addf %12, %11 : vector<16x32xf32>
    %14 = arith.divf %12, %13 : vector<16x32xf32>
    %15 = vector.extract_strided_slice %8 {offsets = [0, 32], sizes = [16, 32], strides = [1, 1]} : vector<16x128xf32> to vector<16x32xf32>
    %16 = arith.negf %15 : vector<16x32xf32>
    %17 = math.exp %16 : vector<16x32xf32>
    %cst_10 = arith.constant 1.000000e+00 : f32
    %18 = vector.broadcast %cst_10 : f32 to vector<16x32xf32>
    %19 = arith.addf %18, %17 : vector<16x32xf32>
    %20 = arith.divf %18, %19 : vector<16x32xf32>
    %21 = vector.extract_strided_slice %8 {offsets = [0, 64], sizes = [16, 32], strides = [1, 1]} : vector<16x128xf32> to vector<16x32xf32>
    %22 = vector.extract_strided_slice %8 {offsets = [0, 96], sizes = [16, 32], strides = [1, 1]} : vector<16x128xf32> to vector<16x32xf32>
    %23 = arith.mulf %14, %22 : vector<16x32xf32>
    %24 = arith.addf %21, %23 : vector<16x32xf32>
    %25 = math.tanh %24 : vector<16x32xf32>
    %26 = arith.extf %0 : vector<16x32xbf16> to vector<16x32xf32>
    %cst_11 = arith.constant 1.000000e+00 : f32
    %27 = vector.broadcast %cst_11 : f32 to vector<16x32xf32>
    %28 = arith.subf %27, %20 : vector<16x32xf32>
    %29 = arith.mulf %28, %25 : vector<16x32xf32>
    %30 = arith.mulf %20, %26 : vector<16x32xf32>
    %31 = arith.addf %29, %30 : vector<16x32xf32>
    %c0_12 = arith.constant 0 : index
    %c0_13 = arith.constant 0 : index
    %32 = vector.load %arg6[%c0_12, %c0_13] : memref<16x32xf32, #tpu.memory_space<vmem>>, vector<16x32xf32>
    tpu.vector_store %arg6[%c0_12, %c0_13], %31 {strides = array<i32>} : memref<16x32xf32, #tpu.memory_space<vmem>>, vector<16x32xf32>,
    return
  }
  func.func @transform_0(%arg0: i32) -> (i32, i32) {
    %c0_i32 = arith.constant 0 : i32
    %c0_i32_0 = arith.constant 0 : i32
    return %arg0, %c0_i32 : i32, i32
  }
  func.func @transform_1(%arg0: i32) -> (i32, i32) {
    %c0_i32 = arith.constant 0 : i32
    %c0_i32_0 = arith.constant 0 : i32
    return %arg0, %c0_i32 : i32, i32
  }
  func.func @transform_2(%arg0: i32) -> (i32, i32) {
    %c0_i32 = arith.constant 0 : i32
    %c0_i32_0 = arith.constant 0 : i32
    return %arg0, %c0_i32 : i32, i32
  }
  func.func @transform_3(%arg0: i32) -> (i32, i32) {
    %c0_i32 = arith.constant 0 : i32
    %c0_i32_0 = arith.constant 0 : i32
    %c0_i32_1 = arith.constant 0 : i32
    return %c0_i32, %c0_i32_0 : i32, i32
  }
  func.func @transform_4(%arg0: i32) -> (i32, i32) {
    %c0_i32 = arith.constant 0 : i32
    %c0_i32_0 = arith.constant 0 : i32
    %c0_i32_1 = arith.constant 0 : i32
    return %c0_i32, %c0_i32_0 : i32, i32
  }
  func.func @transform_5(%arg0: i32) -> (i32, i32) {
    %c0_i32 = arith.constant 0 : i32
    %c0_i32_0 = arith.constant 0 : i32
    return %arg0, %c0_i32 : i32, i32
  }
}

</mosaic_0001>

<bundles_post_ra>
// kernel: tpu_custom_call.1
= control target key start
LH: loop header
LB: loop body
LE: loop exit
PB: predicated region body
PF: predicated region fallthrough
CT: control target
= control target key end

     0   :  { %10 = vsyncpa [#allocation3], 0  ;;  %s638_s0 = inlined_call_operand.hbm [shape: bf16[16,32], index: 0, kind: input, shape index: {}]   ;;  %s639_s1 = inlined_call_operand.hbm [shape: bf16[16,32], index: 1, kind: input, shape index: {}]   ;;  %s640_s2 = inlined_call_operand.hbm [shape: bf16[16,32], index: 2, kind: input, shape index: {}]   ;;  %s641_s3 = inlined_call_operand.hbm [shape: bf16[96,128], index: 3, kind: input, shape index: {}]   ;;  %s642_s4 = inlined_call_operand.vmem [shape: f32[1,128], index: 4, kind: input, shape index: {}]   ;;  %s643_s5 = inlined_call_operand.hbm [shape: f32[16,32], index: 5, kind: output, shape index: {}]  }
   0x1   :  { %11 = vsyncpa [#allocation6], 0 }
   0x2   :  { %12 = vsyncpa [#allocation9], 0 }
   0x3   :  { %13 = vsyncpa [#allocation4], 0  ;;  %s491_s18 = smov [#allocation5]   ;;  %s492_s20 = smov [#allocation2]  }
   0x4   :  { %s31_s19 = sshll.u32 %s491_s18, 4  ;;  %s19_s21 = sshll.u32 %s492_s20, 4  ;;  %s32_s19 = int_to_ptr.vmem [resolvable:$true] %s31_s19  ;;  %s534_s21 = int_to_ptr.vmem [resolvable:$true] %s19_s21 }
   0x5   :  { %s373_s24 = scalar_lea.hbm %s639_s1, 128 }
   0x6   :  { %p374_p0 = scmp.ne.s32.totalorder %s639_s1, %s373_s24  ;;  %p377_p1 = scmp.lt.u32.totalorder %s373_s24, %s639_s1 }
   0x8   :  { %p379_p2 = pnand %p377_p1, %p374_p0 }
   0xa   :  { %382 = shalt.err (!%p379_p2)
}
   0xb   :  { %s383_s29 = scalar_lea.vmem %s32_s19, 128  ;;  %p388_p4 = scmp.lt.s32.totalorder %s32_s19, %s32_s19 }
   0xc   :  { %p384_p3 = scmp.ne.s32.totalorder %s32_s19, %s383_s29  ;;  %p389_p5 = scmp.lt.s32.totalorder %s383_s29, %s383_s29 }
   0xe   :  { %p390_p6 = por %p389_p5, %p388_p4 }
  0x10   :  { %p391_p7 = pnand %p390_p6, %p384_p3 }
  0x12   :  { %394 = shalt.err (!%p391_p7)
}
  0x13   :  { %s493_s30 = smov 64   ;;  %s494_s6 = smov 4  }
  0x14   :  { %37 = dma.hbm_to_vmem [thread:$0]  %s639_s1, 128, %s32_s19, [#allocation6], %s493_s30, %s493_s30, %s494_s6  }
  0x15   :  { %s395_s11 = scalar_lea.hbm %s638_s0, 128 }
  0x16   :  { %p396_p8 = scmp.ne.s32.totalorder %s638_s0, %s395_s11  ;;  %p399_p9 = scmp.lt.u32.totalorder %s395_s11, %s638_s0 }
  0x18   :  { %p401_p10 = pnand %p399_p9, %p396_p8 }
  0x1a   :  { %404 = shalt.err (!%p401_p10)
}
  0x1b   :  { %s405_s16 = scalar_lea.vmem %s534_s21, 128  ;;  %p410_p12 = scmp.lt.s32.totalorder %s534_s21, %s534_s21 }
  0x1c   :  { %p406_p11 = scmp.ne.s32.totalorder %s534_s21, %s405_s16  ;;  %p411_p13 = scmp.lt.s32.totalorder %s405_s16, %s405_s16 }
  0x1e   :  { %p412_p0 = por %p411_p13, %p410_p12 }
  0x20   :  { %p413_p1 = pnand %p412_p0, %p406_p11 }
  0x22   :  { %416 = shalt.err (!%p413_p1)
}
  0x23   :  { %25 = dma.hbm_to_vmem [thread:$0]  %s638_s0, 128, %s534_s21, [#allocation3], %s493_s30, %s493_s30, %s494_s6  }
  0x24   :  { %s495_s18 = smov [#allocation7]   ;;  %s496_s20 = smov [#allocation8]  }
  0x25   :  { %s43_s19 = sshll.u32 %s495_s18, 4  ;;  %s55_s22 = sshll.u32 %s496_s20, 4  ;;  %s44_s19 = int_to_ptr.vmem [resolvable:$true] %s43_s19  ;;  %s571_s22 = int_to_ptr.vmem [resolvable:$true] %s55_s22 }
  0x26   :  { %s417_s25 = scalar_lea.hbm %s640_s2, 128 }
  0x27   :  { %p418_p2 = scmp.ne.s32.totalorder %s640_s2, %s417_s25  ;;  %p421_p3 = scmp.lt.u32.totalorder %s417_s25, %s640_s2 }
  0x29   :  { %p423_p4 = pnand %p421_p3, %p418_p2 }
  0x2b   :  { %426 = shalt.err (!%p423_p4)
}
  0x2c   :  { %s427_s0 = scalar_lea.vmem %s44_s19, 128  ;;  %p432_p6 = scmp.lt.s32.totalorder %s44_s19, %s44_s19 }
  0x2d   :  { %p428_p5 = scmp.ne.s32.totalorder %s44_s19, %s427_s0  ;;  %p433_p7 = scmp.lt.s32.totalorder %s427_s0, %s427_s0 }
  0x2f   :  { %p434_p8 = por %p433_p7, %p432_p6 }
  0x31   :  { %p435_p9 = pnand %p434_p8, %p428_p5 }
  0x33   :  { %438 = shalt.err (!%p435_p9)
}
  0x34   :  { %49 = dma.hbm_to_vmem [thread:$0]  %s640_s2, 128, %s44_s19, [#allocation6], %s493_s30, %s493_s30, %s494_s6  }
  0x35   :  { %s439_s10 = scalar_lea.hbm %s641_s3, 768 }
  0x36   :  { %p440_p10 = scmp.ne.s32.totalorder %s641_s3, %s439_s10  ;;  %p443_p11 = scmp.lt.u32.totalorder %s439_s10, %s641_s3 }
  0x38   :  { %p445_p12 = pnand %p443_p11, %p440_p10 }
  0x3a   :  { %448 = shalt.err (!%p445_p12)
}
  0x3b   :  { %s449_s15 = scalar_lea.vmem %s571_s22, 768  ;;  %p454_p0 = scmp.lt.s32.totalorder %s571_s22, %s571_s22 }
  0x3c   :  { %p450_p13 = scmp.ne.s32.totalorder %s571_s22, %s449_s15  ;;  %p455_p1 = scmp.lt.s32.totalorder %s449_s15, %s449_s15 }
  0x3e   :  { %p456_p2 = por %p455_p1, %p454_p0 }
  0x40   :  { %p457_p3 = pnand %p456_p2, %p450_p13 }
  0x42   :  { %460 = shalt.err (!%p457_p3)
}
  0x43   :  { %61 = dma.hbm_to_vmem [thread:$0]  %s641_s3, 768, %s571_s22, [#allocation9], %s493_s30, %s493_s30, %s494_s6  }
  0x44   :  { %483 = dma.done.wait [#allocation3], 128  }
  0x45   :  { %484 = vsyncadd [#allocation3], 4294967168 }
  0x46   :  { %485 = dma.done.wait [#allocation6], 256  }
  0x47   :  { %486 = vsyncadd [#allocation6], 4294967040 }
  0x48   :  { %487 = dma.done.wait [#allocation9], 768  }
  0x49   :  { %488 = vsyncadd [#allocation9], 4294966528  ;;  %v497_v0 = vmov 0.0   ;;  %vm498_vm0 = vmmov 0   ;;  %v351_v1 = vld [vmem:[#allocation5] sm:$0xff]   ;;  %v608_v2 = vld [vmem:[#allocation7] sm:$0xff]  }
  0x4a   :  { %317 = vmatprep.subr.bf16.mxu0 %v497_v0  ;;  %329 = vmatprep.mubr.msk.bf16.mxu0 %vm498_vm0, %v497_v0  ;;  %s499_s1 = smov 32   ;;  %v353_v3 = vld [vmem:[#allocation8] sm:$0xff]   ;;  %v354_v4 = vld [vmem:[#allocation8 + $0x8] sm:$0xff]   ;;  %v355_v5 = vld [vmem:[#allocation8 + $0x10] sm:$0xff]   ;;  %vm102_vm1 = vcmask 261120   ;;  %vm106_vm2 = vcmask 523264   ;;  %v242_v37 = vunpack.c.l.bf16 %v608_v2  ;;  %v243_v38 = vunpack.c.h.bf16 %v608_v2 }
  0x4b   :  { %93 = vrot.lane.b32.xlu0 %v351_v1, %s499_s1  ;;  %318 = vmatpush3.bf16.msra.mxu0 %v353_v3  ;;  %v356_v6 = vld [vmem:[#allocation8 + $0x18] sm:$0xff]   ;;  %v357_v7 = vld [vmem:[#allocation8 + $0x20] sm:$0xff]   ;;  %v359_v8 = vld [vmem:[#allocation8 + $0x28] sm:$0xff]   ;;  %vm164_vm3 = vcmask 785408  }
  0x4c   :  { %319 = vmatprep.subr.bf16.mxu0 %v497_v0  ;;  %v358_v10 = vld [vmem:[#allocation2] sm:$0xff]   ;;  %v346_v40 = vpack.i.bf16 %v243_v38, %v242_v37 }
  0x4d   :  { %v300_v14 = vld [vmem:[%s642_s4] ss:$0 sm:$0xff]  ;;  %s500_s4 = smov 96  }
  0x4f   :  { %100 = vrot.lane.b32.xlu0 %v608_v2, %s493_s30  ;;  %320 = vmatpush3.bf16.msra.mxu0 %v354_v4 }
  0x50   :  { %321 = vmatprep.subr.bf16.mxu0 %v497_v0 }
  0x53   :  { %322 = vmatpush3.bf16.msra.mxu0 %v355_v5 }
  0x54   :  { %323 = vmatprep.subr.bf16.mxu0 %v497_v0 }
  0x57   :  { %324 = vmatpush3.bf16.msra.mxu0 %v356_v6 }
  0x58   :  { %325 = vmatprep.subr.bf16.mxu0 %v497_v0 }
  0x5b   :  { %326 = vmatpush3.bf16.msra.mxu0 %v357_v7 }
  0x5c   :  { %327 = vmatprep.subr.bf16.mxu0 %v497_v0 }
  0x5f   :  { %328 = vmatpush3.bf16.msra.mxu0 %v359_v8 }
  0xbd   :  { %v94_v9 = vpop.permute.xlu0 %93 }
  0xbe   :  { %v105_v11 = vsel %vm102_vm1, %v358_v10, %v94_v9 }
  0xc1   :  { %v101_v12 = vpop.permute.xlu0 %100 }
  0xc2   :  { %v108_v13 = vsel %vm106_vm2, %v105_v11, %v101_v12 }
  0xc3   :  { %330 = vmatmul.mubr.msk.bf16.vlgmr.msra.gmra.mrb[0].mxu0 %vm164_vm3, %v108_v13 }
 0x196   :  { %v201_v15 = vpop.f32.mrb[0].mxu0 }
 0x197   :  { %v202_v16 = vadd.f32 %v300_v14, %v201_v15  ;;  %v331_v17 = vpop.f32.mrb[1].mxu0 }
 0x198   :  { %v204_v18 = vpop.f32.mrb[2].mxu0 }
 0x199   :  { %222 = vrot.lane.b32.xlu1 %v202_v16, %s499_s1  ;;  %v332_v19 = vpop.f32.mrb[3].mxu0  ;;  %v205_v20 = vadd.f32 %v300_v14, %v204_v18  ;;  %v308_v21 = vmul.f32 -1.442695, %v202_v16 }
 0x19b   :  { %361 = vpow2.f32 %v308_v21  ;;  %v309_v22 = vmul.f32 -1.442695, %v205_v20 }
 0x19d   :  { %224 = vrot.lane.b32.xlu1 %v205_v20, %s499_s1  ;;  %363 = vpow2.f32 %v309_v22 }
 0x1a5   :  { %v362_v23 = vpop.eup %361 }
 0x1a6   :  { %v214_v24 = vadd.f32 1.0, %v362_v23 }
 0x1a7   :  { %v364_v25 = vpop.eup %363 }
 0x1a8   :  { %365 = vrcp.f32 %v214_v24  ;;  %v215_v26 = vadd.f32 1.0, %v364_v25 }
 0x1aa   :  { %367 = vrcp.f32 %v215_v26 }
 0x1b2   :  { %v366_v27 = vpop.eup %365 }
 0x1b3   :  { %v244_v45 = vsub.f32 1.0, %v366_v27 }
 0x1b4   :  { %v368_v30 = vpop.eup %367 }
 0x1b5   :  { %v245_v48 = vsub.f32 1.0, %v368_v30 }
 0x20b   :  { %v223_v28 = vpop.permute.xlu1 %222 }
 0x20c   :  { %v228_v29 = vmul.f32 %v366_v27, %v223_v28 }
 0x20e   :  { %232 = vrot.lane.b32.xlu0 %v228_v29, %s493_s30 }
 0x20f   :  { %v225_v31 = vpop.permute.xlu1 %224 }
 0x210   :  { %v229_v32 = vmul.f32 %v368_v30, %v225_v31 }
 0x212   :  { %234 = vrot.lane.b32.xlu1 %v229_v32, %s493_s30  ;;  %s501_s30 = smov [#allocation10]  }
 0x213   :  { %s283_s17 = sshll.u32 %s501_s30, 4  ;;  %s284_s17 = int_to_ptr.vmem [resolvable:$true] %s283_s17 }
 0x214   :  { %s461_s18 = scalar_lea.vmem %s284_s17, 256  ;;  %p466_p5 = scmp.lt.s32.totalorder %s284_s17, %s284_s17 }
 0x215   :  { %p462_p4 = scmp.ne.s32.totalorder %s284_s17, %s461_s18  ;;  %p467_p6 = scmp.lt.s32.totalorder %s461_s18, %s461_s18 }
 0x217   :  { %p468_p7 = por %p467_p6, %p466_p5 }
 0x219   :  { %p469_p8 = pnand %p468_p7, %p462_p4 }
 0x280   :  { %v233_v33 = vpop.permute.xlu0 %232 }
 0x281   :  { %v238_v34 = vadd.f32 %v233_v33, %v202_v16 }
 0x283   :  { %369 = vtanh.f32 %v238_v34 }
 0x284   :  { %v235_v35 = vpop.permute.xlu1 %234 }
 0x285   :  { %v239_v36 = vadd.f32 %v235_v35, %v205_v20 }
 0x287   :  { %371 = vtanh.f32 %v239_v36 }
 0x28d   :  { %v370_v39 = vpop.eup %369 }
 0x28e   :  { %248 = vrot.lane.b32.xlu0 %v370_v39, %s500_s4 }
 0x291   :  { %v372_v41 = vpop.eup %371 }
 0x292   :  { %347 = vrot.lane.b32.xlu0 %v346_v40, %s499_s1  ;;  %250 = vrot.lane.b32.xlu1 %v372_v41, %s500_s4 }
 0x300   :  { %v249_v42 = vpop.permute.xlu0 %248 }
 0x301   :  { %v254_v49 = vmul.f32 %v249_v42, %v244_v45 }
 0x304   :  { %v348_v43 = vpop.permute.xlu0 %347  ;;  %v251_v44 = vpop.permute.xlu1 %250 }
 0x305   :  { %v350_v46 = vunpack.i.h.bf16 %v348_v43  ;;  %v349_v47 = vunpack.i.l.bf16 %v348_v43  ;;  %v255_v52 = vmul.f32 %v251_v44, %v245_v48 }
 0x307   :  { %v264_v50 = vmul.f32 %v366_v27, %v349_v47  ;;  %v265_v51 = vmul.f32 %v368_v30, %v350_v46 }
 0x309   :  { %v267_v53 = vadd.f32 %v265_v51, %v255_v52  ;;  %v266_v54 = vadd.f32 %v264_v50, %v254_v49 }
 0x30b   :  { %270 = vrot.lane.b32.xlu1 %v266_v54, %s500_s4  ;;  %272 = vrot.lane.b32.xlu0 %v267_v53, %s500_s4 }
 0x37d   :  { %v273_v55 = vpop.permute.xlu0 %272  ;;  %v271_v56 = vpop.permute.xlu1 %270 }
 0x37e   :  { %277 = vst.msk [vmem:[#allocation10 + $0x8] sm:$0xff] %vm102_vm1, %v273_v55  ;;  %276 = vst.msk [vmem:[#allocation10] sm:$0xff] %vm102_vm1, %v271_v56 }
 0x37f   :  { %472 = shalt.err (!%p469_p8)
}
 0x380   :  { %s473_s22 = scalar_lea.hbm %s643_s5, 256 }
 0x381   :  { %p474_p9 = scmp.ne.s32.totalorder %s643_s5, %s473_s22  ;;  %p477_p10 = scmp.lt.u32.totalorder %s473_s22, %s643_s5 }
 0x383   :  { %p479_p11 = pnand %p477_p10, %p474_p9 }
 0x385   :  { %482 = shalt.err (!%p479_p11)
}
 0x386   :  { %s502_s27 = smov 128   ;;  %s503_s28 = smov 8  }
 0x387   :  { %289 = dma.vmem_to_hbm [thread:$0]  %s284_s17, 256, %s643_s5, [#allocation4], %s502_s27, %s502_s27, %s503_s28  }
 0x388   :  { %489 = dma.done.wait [#allocation4], 256  }
 0x389   :  { %490 = vsyncadd [#allocation4], 4294967040 }
 0x38a   :  { %293 = vsyncpa [#allocation3], 1 }
 0x38b   :  { %294 = vsyncpa [#allocation6], 1 }
 0x38c   :  { %295 = vsyncpa [#allocation9], 1 }
 0x38d   :  { %296 = vsyncpa [#allocation4], 1 }

</bundles_post_ra>
